<compile_context>
chip_gen: v7x
topology: tpu7x:2x2x1
jax: 0.10.0
libtpu: 0.0.40
codegen_flags: <defaults>
</compile_context>

<pallas_src>
import functools

import jax
import jax.numpy as jnp
from jax.experimental import pallas as pl
from jax.experimental.pallas import tpu as pltpu


def _complex_score_kernel(c_ref, x_ref, o_ref, *, margin):
    # c_ref: (TB, 1|TN, 2D) f32 "combined" operand (resident across N tiles
    #        when its candidate dim is 1); x_ref: (TB, TN|1, 2D) streamed operand.
    prod = c_ref[...] * x_ref[...].astype(jnp.float32)   # broadcasts over dim 1
    s = jnp.sum(prod, axis=-1)                            # f32 accumulation (XLU)
    if margin is not None:
        s = s + jnp.float32(margin)
    o_ref[...] = s.astype(o_ref.dtype)                    # (TB, TN) lane-dense store


def _choose_tiles(B, N, row_bytes):
    """Pick (TB, TN): streamed tile ~4 MiB; block dims full-extent or (8,128)-aligned."""
    TB = B if B <= 8 else 8
    budget_rows = max(128, (4 << 20) // max(1, TB * row_bytes))
    if N <= budget_rows:
        return TB, N
    return TB, (budget_rows // 128) * 128


def complex_score(head, relation, tail, mode, margin=None, *, tile_n=None, tile_b=None):
    """ComplEx forward. head/relation/tail: (B, Nx, 2*D) with Nx in {1, N}."""
    B, _, two_d = head.shape
    assert relation.shape[2] == two_d and tail.shape[2] == two_d
    assert two_d % 2 == 0
    half = two_d // 2
    N = max(head.shape[1], relation.shape[1], tail.shape[1])
    for x in (head, relation, tail):
        assert x.shape[0] == B and x.shape[1] in (1, N)

    f32 = jnp.float32
    # Combine the two non-streamed operands once (tiny op; normally (B, 1, 2D)).
    if mode == 'head-batch':
        re_r, im_r = relation[..., :half].astype(f32), relation[..., half:].astype(f32)
        re_t, im_t = tail[..., :half].astype(f32), tail[..., half:].astype(f32)
        re_c = re_r * re_t + im_r * im_t
        im_c = re_r * im_t - im_r * re_t
        big = head
    else:  # 'tail-batch' / single
        re_h, im_h = head[..., :half].astype(f32), head[..., half:].astype(f32)
        re_r, im_r = relation[..., :half].astype(f32), relation[..., half:].astype(f32)
        re_c = re_h * re_r - im_h * im_r
        im_c = re_h * im_r + im_h * re_r
        big = tail
    combined = jnp.concatenate([re_c, im_c], axis=-1)     # (B, Nc, 2D) float32

    Nc, Nb = combined.shape[1], big.shape[1]
    out_dtype = head.dtype
    big_item = jnp.dtype(big.dtype).itemsize
    out_item = jnp.dtype(out_dtype).itemsize

    # Bytes per candidate row that actually scale with TN inside one tile.
    row_bytes = (two_d * big_item if Nb > 1 else 0) + (two_d * 4 if Nc > 1 else 0)
    row_bytes = max(row_bytes, two_d * big_item)

    TB, TN = _choose_tiles(B, N, row_bytes)
    if tile_b is not None:
        TB = min(tile_b, B)
    if tile_n is not None:
        TN = N if tile_n >= N else tile_n
        assert TN == N or TN % 128 == 0, "tile_n must be a multiple of 128"

    def in_spec(n_cand):
        if n_cand == 1:
            # Broadcast operand: constant along the N-tile axis -> DMA'd once
            # per batch tile and kept resident in VMEM.
            return pl.BlockSpec((TB, 1, two_d), lambda b, n: (b, 0, 0))
        return pl.BlockSpec((TB, TN, two_d), lambda b, n: (b, n, 0))

    # VMEM budget: double-buffered input/output tiles + f32 intermediates
    # (product + cast copy) + headroom.  Kept well under v7x's 64 MiB physical.
    comb_rows = 1 if Nc == 1 else TN
    big_rows = 1 if Nb == 1 else TN
    tile_elems_f32 = TB * TN * two_d * 4            # full-rank f32 intermediate
    needed = (2 * TB * (big_rows * two_d * big_item
                        + comb_rows * two_d * 4
                        + TN * out_item)
              + 3 * tile_elems_f32                  # prod + cast copies
              + (4 << 20))
    vmem_limit = int(min(48 << 20, max(16 << 20, needed)))

    kernel = functools.partial(_complex_score_kernel, margin=margin)
    out = pl.pallas_call(
        kernel,
        out_shape=jax.ShapeDtypeStruct((B, N), out_dtype),
        grid=(pl.cdiv(B, TB), pl.cdiv(N, TN)),
        in_specs=[in_spec(Nc), in_spec(Nb)],
        out_specs=pl.BlockSpec((TB, TN), lambda b, n: (b, n)),
        compiler_params=pltpu.CompilerParams(
            dimension_semantics=("parallel", "parallel"),
            vmem_limit_bytes=vmem_limit),
    )(combined, big)
    return out


def _complex_ref(head, relation, tail, mode, margin=None):
    """Pure-JAX reference mirroring the PyTorch module exactly."""
    re_h, im_h = jnp.split(head, 2, axis=2)
    re_r, im_r = jnp.split(relation, 2, axis=2)
    re_t, im_t = jnp.split(tail, 2, axis=2)
    if mode == 'head-batch':
        re_s = re_r * re_t + im_r * im_t
        im_s = re_r * im_t - im_r * re_t
        score = re_h * re_s + im_h * im_s
    else:
        re_s = re_h * re_r - im_h * im_r
        im_s = re_h * im_r + im_h * re_r
        score = re_s * re_t + im_s * im_t
    s = jnp.sum(score, axis=2)
    if margin is not None:
        s = margin + s
    return s


if __name__ == "__main__":
    key = jax.random.PRNGKey(0)
    B, N, D = 2, 8, 32            # stored embedding dim = 2*D = 64
    margin = 9.0
    k1, k2, k3, k4, k5 = jax.random.split(key, 5)

    # mode = 'tail-batch': one (head, relation) pair scored against N tails
    head_tb = jax.random.normal(k1, (B, 1, 2 * D), dtype=jnp.float32)
    rel_tb = jax.random.normal(k2, (B, 1, 2 * D), dtype=jnp.float32)
    tail_tb = jax.random.normal(k3, (B, N, 2 * D), dtype=jnp.float32)

    out_tb = complex_score(head_tb, rel_tb, tail_tb, 'tail-batch', margin)
    jax.block_until_ready(out_tb)
    ref_tb = _complex_ref(head_tb, rel_tb, tail_tb, 'tail-batch', margin)
    assert out_tb.shape == (B, N)
    assert jnp.allclose(out_tb, ref_tb, atol=1e-4, rtol=1e-4)

    # mode = 'head-batch': N candidate heads against one (relation, tail) pair
    head_hb = jax.random.normal(k4, (B, N, 2 * D), dtype=jnp.float32)
    out_hb = complex_score(head_hb, rel_tb, tail_tb[:, :1], 'head-batch', margin)
    jax.block_until_ready(out_hb)
    ref_hb = _complex_ref(head_hb, rel_tb, tail_tb[:, :1], 'head-batch', margin)
    assert out_hb.shape == (B, N)
    assert jnp.allclose(out_hb, ref_hb, atol=1e-4, rtol=1e-4)

    # margin=None path + multi-tile grid over N (partial last tile exercised)
    N2, D2 = 300, 64
    head2 = jax.random.normal(k5, (B, 1, 2 * D2), dtype=jnp.float32)
    rel2 = jax.random.normal(k2, (B, 1, 2 * D2), dtype=jnp.float32)
    tail2 = jax.random.normal(k3, (B, N2, 2 * D2), dtype=jnp.float32)
    out2 = complex_score(head2, rel2, tail2, 'tail-batch', None, tile_n=128)
    jax.block_until_ready(out2)
    ref2 = _complex_ref(head2, rel2, tail2, 'tail-batch', None)
    assert out2.shape == (B, N2)
    assert jnp.allclose(out2, ref2, atol=1e-4, rtol=1e-4)

    # bf16 streamed operand (mixed precision path, f32 accumulation)
    tail_bf = tail_tb.astype(jnp.bfloat16)
    out_bf = complex_score(head_tb, rel_tb, tail_bf, 'tail-batch', margin)
    jax.block_until_ready(out_bf)
    ref_bf = _complex_ref(head_tb.astype(jnp.float32), rel_tb.astype(jnp.float32),
                          tail_bf.astype(jnp.float32), 'tail-batch', margin)
    assert jnp.allclose(out_bf, ref_bf, atol=5e-2, rtol=5e-2)

    print("KERNEL_OK")
</pallas_src>

<mosaic_0001>
module attributes {stable_mosaic.version = 11 : i64} {
  func.func @_complex_score_kernel(%arg0: i32, %arg1: i32, %arg2: memref<2x1x64xf32, #tpu.memory_space<vmem>>, %arg3: memref<2x8x64xf32, #tpu.memory_space<vmem>>, %arg4: memref<2x8xf32, #tpu.memory_space<vmem>>) attributes {dimension_semantics = [#tpu.dimension_semantics<parallel>, #tpu.dimension_semantics<parallel>], iteration_bounds = array<i64: 1, 1>, scalar_prefetch = 0 : i64, scratch_operands = 0 : i64, tpu.core_type = #tpu.core_type<tc>, window_params = [{transform_indices = @transform_0, window_bounds = array<i64: 2, 1, 64>}, {transform_indices = @transform_1, window_bounds = array<i64: 2, 8, 64>}, {transform_indices = @transform_2, window_bounds = array<i64: 2, 8>}]} {
    %c0 = arith.constant 0 : index
    %c0_0 = arith.constant 0 : index
    %c0_1 = arith.constant 0 : index
    %0 = vector.load %arg2[%c0, %c0_0, %c0_1] : memref<2x1x64xf32, #tpu.memory_space<vmem>>, vector<2x1x64xf32>
    %c0_2 = arith.constant 0 : index
    %c0_3 = arith.constant 0 : index
    %c0_4 = arith.constant 0 : index
    %1 = vector.load %arg3[%c0_2, %c0_3, %c0_4] : memref<2x8x64xf32, #tpu.memory_space<vmem>>, vector<2x8x64xf32>
    %2 = vector.broadcast %0 : vector<2x1x64xf32> to vector<2x8x64xf32>
    %3 = arith.mulf %2, %1 : vector<2x8x64xf32>
    %cst = arith.constant dense<0.000000e+00> : vector<2x8xf32>
    %4 = vector.multi_reduction <add>, %3, %cst [2] : vector<2x8x64xf32> to vector<2x8xf32>
    %cst_5 = arith.constant 9.000000e+00 : f32
    %5 = vector.broadcast %cst_5 : f32 to vector<2x8xf32>
    %6 = arith.addf %4, %5 : vector<2x8xf32>
    %c0_6 = arith.constant 0 : index
    %c0_7 = arith.constant 0 : index
    %7 = vector.load %arg4[%c0_6, %c0_7] : memref<2x8xf32, #tpu.memory_space<vmem>>, vector<2x8xf32>
    tpu.vector_store %arg4[%c0_6, %c0_7], %6 {strides = array<i32>} : memref<2x8xf32, #tpu.memory_space<vmem>>, vector<2x8xf32>,
    return
  }
  func.func @transform_0(%arg0: i32, %arg1: i32) -> (i32, i32, i32) {
    %c0_i32 = arith.constant 0 : i32
    %c0_i32_0 = arith.constant 0 : i32
    %c0_i32_1 = arith.constant 0 : i32
    return %arg0, %c0_i32, %c0_i32_0 : i32, i32, i32
  }
  func.func @transform_1(%arg0: i32, %arg1: i32) -> (i32, i32, i32) {
    %c0_i32 = arith.constant 0 : i32
    %c0_i32_0 = arith.constant 0 : i32
    return %arg0, %arg1, %c0_i32 : i32, i32, i32
  }
  func.func @transform_2(%arg0: i32, %arg1: i32) -> (i32, i32) {
    %c0_i32 = arith.constant 0 : i32
    return %arg0, %arg1 : i32, i32
  }
}

</mosaic_0001>

<bundles_post_ra>
// kernel: tpu_custom_call.1
= control target key start
LH: loop header
LB: loop body
LE: loop exit
PB: predicated region body
PF: predicated region fallthrough
CT: control target
= control target key end

     0   :  { %7 = vsyncpa [#allocation3], 0  ;;  %s239_s0 = inlined_call_operand.hbm [shape: f32[2,1,64], index: 0, kind: input, shape index: {}]   ;;  %s240_s1 = inlined_call_operand.hbm [shape: f32[2,8,64], index: 1, kind: input, shape index: {}]   ;;  %s241_s2 = inlined_call_operand.hbm [shape: f32[2,8], index: 2, kind: output, shape index: {}]  }
   0x1   :  { %8 = vsyncpa [#allocation6], 0 }
   0x2   :  { %9 = vsyncpa [#allocation4], 0  ;;  %s181_s9 = smov [#allocation2]   ;;  %s109_s13 = scalar_lea.hbm %s239_s0, 32 }
   0x3   :  { %s15_s10 = sshll.u32 %s181_s9, 4  ;;  %p110_p0 = scmp.ne.s32.totalorder %s239_s0, %s109_s13  ;;  %s16_s10 = int_to_ptr.vmem [resolvable:$true] %s15_s10 }
   0x4   :  { %p113_p1 = scmp.lt.u32.totalorder %s109_s13, %s239_s0 }
   0x6   :  { %p115_p2 = pnand %p113_p1, %p110_p0 }
   0x8   :  { %118 = shalt.err (!%p115_p2)
}
   0x9   :  { %s119_s18 = scalar_lea.vmem %s16_s10, 32  ;;  %p124_p4 = scmp.lt.s32.totalorder %s16_s10, %s16_s10 }
   0xa   :  { %p120_p3 = scmp.ne.s32.totalorder %s16_s10, %s119_s18  ;;  %p125_p5 = scmp.lt.s32.totalorder %s119_s18, %s119_s18 }
   0xc   :  { %p126_p6 = por %p125_p5, %p124_p4 }
   0xe   :  { %p127_p7 = pnand %p126_p6, %p120_p3 }
  0x10   :  { %130 = shalt.err (!%p127_p7)
}
  0x11   :  { %s182_s19 = smov 16   ;;  %s183_s20 = smov 1  }
  0x12   :  { %21 = dma.hbm_to_vmem [thread:$0]  %s239_s0, 32, %s16_s10, [#allocation3], %s182_s19, %s182_s19, %s183_s20  }
  0x13   :  { %s184_s23 = smov [#allocation5]   ;;  %s131_s27 = scalar_lea.hbm %s240_s1, 256 }
  0x14   :  { %s27_s24 = sshll.u32 %s184_s23, 4  ;;  %p132_p8 = scmp.ne.s32.totalorder %s240_s1, %s131_s27  ;;  %s28_s24 = int_to_ptr.vmem [resolvable:$true] %s27_s24 }
  0x15   :  { %p135_p9 = scmp.lt.u32.totalorder %s131_s27, %s240_s1 }
  0x17   :  { %p137_p10 = pnand %p135_p9, %p132_p8 }
  0x19   :  { %140 = shalt.err (!%p137_p10)
}
  0x1a   :  { %s141_s4 = scalar_lea.vmem %s28_s24, 256  ;;  %p146_p12 = scmp.lt.s32.totalorder %s28_s24, %s28_s24 }
  0x1b   :  { %p142_p11 = scmp.ne.s32.totalorder %s28_s24, %s141_s4  ;;  %p147_p13 = scmp.lt.s32.totalorder %s141_s4, %s141_s4 }
  0x1d   :  { %p148_p0 = por %p147_p13, %p146_p12 }
  0x1f   :  { %p149_p1 = pnand %p148_p0, %p142_p11 }
  0x21   :  { %152 = shalt.err (!%p149_p1)
}
  0x22   :  { %s185_s0 = smov 128   ;;  %s186_s5 = smov 8  }
  0x23   :  { %33 = dma.hbm_to_vmem [thread:$0]  %s240_s1, 256, %s28_s24, [#allocation6], %s185_s0, %s185_s0, %s186_s5  }
  0x24   :  { %175 = dma.done.wait [#allocation3], 32  }
  0x25   :  { %176 = vsyncadd [#allocation3], 4294967264 }
  0x26   :  { %177 = dma.done.wait [#allocation6], 256  }
  0x27   :  { %178 = vsyncadd [#allocation6], 4294967040  ;;  %v100_v0 = vld [vmem:[#allocation2] ss:$0 sm:$0xff]  ;;  %v42_v1 = vld [vmem:[#allocation5] sm:$0xff]  ;;  %vm58_vm0 = vcmask 523264   ;;  %v69_v8 = vlaneseq }
  0x28   :  { %v101_v2 = vld [vmem:[#allocation2 + $0x1] ss:$0 sm:$0xff]  ;;  %v56_v3 = vmul.f32 %v100_v0, %v42_v1  ;;  %v43_v4 = vld [vmem:[#allocation5 + $0x8] sm:$0xff]  ;;  %s187_s1 = smov [#allocation7]   ;;  %vm79_vm1 = vcmask 1041409   ;;  %vm82_vm2 = vcmask 58368  }
  0x29   :  { %v57_v5 = vmul.f32 %v101_v2, %v43_v4  ;;  %v70_v9 = vand.u32 127, %v69_v8  ;;  %v72_v10 = vshrl.u32 %v69_v8, 7  ;;  %s90_s8 = sshll.u32 %s187_s1, 4  ;;  %s91_s8 = int_to_ptr.vmem [resolvable:$true] %s90_s8 }
  0x2a   :  { %v59_v6 = vsel %vm58_vm0, %v56_v3, 0.0  ;;  %s153_s9 = scalar_lea.vmem %s91_s8, 32  ;;  %p158_p3 = scmp.lt.s32.totalorder %s91_s8, %s91_s8 }
  0x2b   :  { %60 = vadd.xlane.f32.xlu0 %v59_v6  ;;  %v62_v7 = vsel %vm58_vm0, %v57_v5, 0.0  ;;  %v73_v12 = vsub.s32 %v70_v9, %v72_v10  ;;  %p154_p2 = scmp.ne.s32.totalorder %s91_s8, %s153_s9  ;;  %p159_p4 = scmp.lt.s32.totalorder %s153_s9, %s153_s9 }
  0x2d   :  { %p160_p5 = por %p159_p4, %p158_p3 }
  0x2f   :  { %63 = vadd.xlane.f32.xlu0 %v62_v7  ;;  %p161_p6 = pnand %p160_p5, %p154_p2 }
  0xb8   :  { %v61_v11 = vpop.xlane.xlu0 %60 }
  0xb9   :  { %v65_v13 = vadd.f32 9.0, %v61_v11 }
  0xbb   :  { %v74_v16 = vrot.slane %v65_v13, %v73_v12 }
  0xbc   :  { %v64_v14 = vpop.xlane.xlu0 %63 }
  0xbd   :  { %v66_v15 = vadd.f32 9.0, %v64_v14 }
  0xbf   :  { %v78_v17 = vrot.slane %v66_v15, %v73_v12 }
  0xc1   :  { %v80_v18 = vsel %vm79_vm1, %v78_v17, %v74_v16 }
  0xc2   :  { %83 = vst.msk [vmem:[#allocation7] sm:$0x3] %vm82_vm2, %v80_v18 }
  0xc3   :  { %164 = shalt.err (!%p161_p6)
}
  0xc4   :  { %s165_s12 = scalar_lea.hbm %s241_s2, 32 }
  0xc5   :  { %p166_p7 = scmp.ne.s32.totalorder %s241_s2, %s165_s12  ;;  %p169_p8 = scmp.lt.u32.totalorder %s165_s12, %s241_s2 }
  0xc7   :  { %p171_p9 = pnand %p169_p8, %p166_p7 }
  0xc9   :  { %174 = shalt.err (!%p171_p9)
}
  0xca   :  { %93 = dma.vmem_to_hbm [thread:$0]  %s91_s8, 32, %s241_s2, [#allocation4]  }
  0xcb   :  { %179 = dma.done.wait [#allocation4], 32  }
  0xcc   :  { %180 = vsyncadd [#allocation4], 4294967264 }
  0xcd   :  { %97 = vsyncpa [#allocation3], 1 }
  0xce   :  { %98 = vsyncpa [#allocation6], 1 }
  0xcf   :  { %99 = vsyncpa [#allocation4], 1 }

</bundles_post_ra>
